<compile_context>
chip_gen: v5e
topology: v5e:2x2
jax: 0.10.0
libtpu: 0.0.40
codegen_flags: <defaults>
</compile_context>

<pallas_src>
import jax
import jax.numpy as jnp
import numpy as np
from jax.experimental import pallas as pl
from jax.experimental.pallas import tpu as pltpu


def _autodiff_kernel(wt_ref, j_ref):
    # wt_ref: (1, TI*nx)   rows i..i+TI of W^T, flattened lane-dense
    #                      (this IS J[b, i:i+TI, :] for every b)
    # j_ref : (TB, TI*nx)  output Jacobian slab tile
    #
    # Pure write-bound kernel: sublane-broadcast the (1, L) row block across
    # the TB batch rows in-register and store.  No MXU / no basis materialized.
    j_ref[...] = jnp.broadcast_to(wt_ref[...], j_ref.shape).astype(j_ref.dtype)


def _choose_tiles(nbatch, ny, nx, itemsize):
    """Pick (tb, ti) so tiles are lane-dense, (8,128)-legal, a few MiB, and
    the grid has >= 2 steps along a parallel axis when possible (v7x 2 TCs)."""
    tile_budget = 4 << 20  # ~4 MiB per output tile (double-buffered by Pallas)

    # ti: divisor of ny with (ti*nx) % 128 == 0 (unmasked full-lane stores),
    # or the full extent.
    ti_cands = [t for t in range(1, ny + 1)
                if ny % t == 0 and ((t * nx) % 128 == 0 or t == ny)]
    ti = max([t for t in ti_cands if t * nx * itemsize <= tile_budget],
             default=min(ti_cands))

    # tb: divisor of nbatch that is a multiple of 8, or the full extent.
    tb_cands = [t for t in range(1, nbatch + 1)
                if nbatch % t == 0 and (t % 8 == 0 or t == nbatch)]
    tb = max([t for t in tb_cands if t * ti * nx * itemsize <= tile_budget],
             default=min(tb_cands))

    # Prefer >= 2 grid steps so dimension_semantics=("parallel","parallel")
    # actually shards work across v7x's two TensorCores.
    if nbatch // tb == 1 and ny // ti == 1:
        smaller_ti = [t for t in ti_cands if t < ti]
        smaller_tb = [t for t in tb_cands if t < tb]
        if smaller_ti:
            ti = max(smaller_ti)
        elif smaller_tb:
            tb = max(smaller_tb)
    return tb, ti


def autodiff_jacobian(y, x, W, *, tb=None, ti=None, out_dtype=jnp.float32):
    """JAX/Pallas port of AutoDiff.forward for the synthetic map y = x @ W.

    Returns J of shape (nbatch, ny, nx) with J[b, i, :] = VJP(y, x, e_i)[b].
    NOTE: the batch broadcast (J identical for every b) is only valid because
    the instantiated map is linear; an x-dependent Jacobian would need the
    full per-sample VJP instead.
    """
    nbatch, nx = x.shape
    nbatch_y, ny = y.shape
    assert nbatch == nbatch_y
    assert W.shape == (nx, ny)
    itemsize = jnp.dtype(out_dtype).itemsize

    if tb is None or ti is None:
        atb, ati = _choose_tiles(nbatch, ny, nx, itemsize)
        tb = atb if tb is None else tb
        ti = ati if ti is None else ti
    assert nbatch % tb == 0 and ny % ti == 0
    assert (tb % 8 == 0) or (tb == nbatch)
    assert ((ti * nx) % 128 == 0) or (ti == ny)

    # One cheap XLA transpose+reshape: lane-dense slab of W^T.
    # wt_slab[0, i*nx + j] = W[j, i] = J[b, i, j] for all b.
    wt_slab = jnp.transpose(W).reshape(1, ny * nx).astype(out_dtype)

    grid = (nbatch // tb, ny // ti)

    # Explicit VMEM budget: double-buffered output tile + double-buffered
    # wt row-block + headroom; safe on v7x (64 MiB physical / 32 MiB scoped).
    vmem_needed = 2 * (tb * ti * nx + ti * nx) * itemsize + (1 << 20)
    vmem_limit = int(min(max(vmem_needed, 16 << 20), 128 << 20))

    j_slab = pl.pallas_call(
        _autodiff_kernel,
        out_shape=jax.ShapeDtypeStruct((nbatch, ny * nx), out_dtype),
        grid_spec=pltpu.PrefetchScalarGridSpec(
            num_scalar_prefetch=0,
            grid=grid,
            in_specs=[
                # row block of W^T depends only on the ny-tile index
                pl.BlockSpec((1, ti * nx), lambda b, i: (0, i)),
            ],
            out_specs=pl.BlockSpec((tb, ti * nx), lambda b, i: (b, i)),
        ),
        compiler_params=pltpu.CompilerParams(
            dimension_semantics=("parallel", "parallel"),
            vmem_limit_bytes=vmem_limit,
        ),
        cost_estimate=pl.CostEstimate(
            flops=0,
            transcendentals=0,
            bytes_accessed=(nbatch * ny * nx + ny * nx) * itemsize,
        ),
    )(wt_slab)

    return j_slab.reshape(nbatch, ny, nx)


def _reference_autodiff(y, x, W):
    """Pure-JAX reference mirroring the torch module's autograd loop."""
    nbatch, nx = x.shape
    ny = y.shape[1]
    f = lambda xx: xx @ W
    _, vjp_fn = jax.vjp(f, x)
    J = np.zeros((nbatch, ny, nx), dtype=np.float32)
    for i in range(ny):
        v = jnp.zeros((nbatch, ny), dtype=jnp.float32).at[:, i].set(1.0)
        (vJ,) = vjp_fn(v)
        # TODO(synk): torch's `if vJ is None: break` early-exit (failed grad
        # graph) has no Pallas/JAX equivalent and is intentionally dropped.
        J[:, i, :] = np.asarray(vJ)
    return J


if __name__ == "__main__":
    key = jax.random.PRNGKey(0)
    k_x, k_w = jax.random.split(key)

    nbatch, nx, ny = 8, 32, 16
    x = jax.random.normal(k_x, (nbatch, nx), dtype=jnp.float32)
    # deterministic "weights" of the synthetic differentiable map y = x @ W
    W = jax.random.normal(k_w, (nx, ny), dtype=jnp.float32) / jnp.sqrt(nx)
    y = x @ W  # glue: forward pass producing y (its shape defines ny)

    # auto tiling: (tb, ti) = (8, 8) here -> 2 grid steps along the parallel
    # ny axis, lane dim ti*nx = 256 (unmasked full-lane stores)
    J = autodiff_jacobian(y, x, W)
    jax.block_until_ready(J)

    np.testing.assert_allclose(
        np.asarray(J), _reference_autodiff(y, x, W), rtol=1e-5, atol=1e-5)

    print("KERNEL_OK")
</pallas_src>

<mosaic_0001>
module attributes {stable_mosaic.version = 11 : i64} {
  func.func @_autodiff_kernel(%arg0: i32, %arg1: i32, %arg2: memref<1x256xf32, #tpu.memory_space<vmem>>, %arg3: memref<8x256xf32, #tpu.memory_space<vmem>>) attributes {dimension_semantics = [#tpu.dimension_semantics<parallel>, #tpu.dimension_semantics<parallel>], iteration_bounds = array<i64: 1, 2>, scalar_prefetch = 0 : i64, scratch_operands = 0 : i64, tpu.core_type = #tpu.core_type<tc>, window_params = [{transform_indices = @transform_0, window_bounds = array<i64: 1, 256>}, {transform_indices = @transform_1, window_bounds = array<i64: 8, 256>}]} {
    %c0 = arith.constant 0 : index
    %c0_0 = arith.constant 0 : index
    %0 = vector.load %arg2[%c0, %c0_0] : memref<1x256xf32, #tpu.memory_space<vmem>>, vector<1x256xf32>
    %1 = vector.shape_cast %0 : vector<1x256xf32> to vector<1x256xf32>
    %2 = vector.broadcast %1 : vector<1x256xf32> to vector<8x256xf32>
    %c0_1 = arith.constant 0 : index
    %c0_2 = arith.constant 0 : index
    %3 = vector.load %arg3[%c0_1, %c0_2] : memref<8x256xf32, #tpu.memory_space<vmem>>, vector<8x256xf32>
    tpu.vector_store %arg3[%c0_1, %c0_2], %2 {strides = array<i32>} : memref<8x256xf32, #tpu.memory_space<vmem>>, vector<8x256xf32>,
    return
  }
  func.func @transform_0(%arg0: i32, %arg1: i32) -> (i32, i32) {
    %c0_i32 = arith.constant 0 : i32
    %c0_i32_0 = arith.constant 0 : i32
    return %c0_i32, %arg1 : i32, i32
  }
  func.func @transform_1(%arg0: i32, %arg1: i32) -> (i32, i32) {
    %c0_i32 = arith.constant 0 : i32
    return %arg0, %arg1 : i32, i32
  }
}

</mosaic_0001>

<bundles_post_ra>
// kernel: tpu_custom_call.1
= control target key start
LH: loop header
LB: loop body
LE: loop exit
PB: predicated region body
PF: predicated region fallthrough
CT: control target
= control target key end

     0   :  { %6 = vsyncpa [#allocation3], 0  ;;  %s580_s0 = inlined_call_operand.hbm [shape: f32[1,512], index: 0, kind: input, shape index: {}]   ;;  %s581_s1 = inlined_call_operand.hbm [shape: f32[8,512], index: 1, kind: output, shape index: {}]  }
   0x1   :  { %8 = vsyncpa [#allocation3 + $0x1], 0 }
   0x2   :  { %9 = vsyncpa [#allocation4], 0 }
   0x3   :  { %11 = vsyncpa [#allocation4 + $0x1], 0  ;;  %s459_s6 = smov 0   ;;  %s461_s7 = smov 0  }
   0x4   :  { %s463_s8 = smov 0   ;;  %s465_s9 = smov 0  }
   0x5   :  { %s467_s10 = smov 0   ;;  %s469_s11 = smov 0  }
   0x6 LB: > { %s258_s12 = sadd.s32 4294967295, %s447_s11   ;;  %s259_s13 = sadd.s32 4294967294, %s447_s11   ;;  %s447_s11 = sphi %s469_s11, %s17_s11   ;;  %s443_s10 = sphi %s467_s10, %s590_s10   ;;  %s439_s9 = sphi %s465_s9, %s589_s9   ;;  %s435_s8 = sphi %s463_s8, %s588_s8   ;;  %s431_s7 = sphi %s461_s7, %s587_s7   ;;  %s427_s6 = sphi %s459_s6, %s586_s6  }
   0x7   : > { %s26_s14 = sadd.s32 1, %s443_s10  ;;  %s36_s15 = sadd.s32 1, %s435_s8 }
   0x8   : > { %p27_p0 = scmp.ge.s32.totalorder %s26_s14, 2  ;;  %p43_p1 = scmp.ne.s32.totalorder %s435_s8, %s431_s7 }
   0x9   : > { %p44_p2 = scmp.eq.s32.totalorder %s447_s11, 0  ;;  %p49_p3 = scmp.ne.s32.totalorder %s431_s7, %s427_s6 }
   0xa   : > { %s592_s14 = smov (%p27_p0, %s26_s14), 0  ;;  %p50_p5 = scmp.eq.s32.totalorder %s258_s12, 0 }
   0xb   : > { %p500_p4 = por %p44_p2, %p43_p1  ;;  %s33_s17 = ssub.s32 %s443_s10, %s592_s14 }
   0xc   : > { %p75_p6 = scmp.eq.s32.totalorder %s258_s12, 1  ;;  %p34_p7 = scmp.eq.s32.totalorder %s33_s17, 0 }
   0xd   : > { %p506_p8 = por %p50_p5, %p49_p3  ;;  %p81_p10 = scmp.eq.s32.totalorder %s259_s13, 1 }
   0xe   : > { %p510_p9 = por %p75_p6, %p43_p1  ;;  %p261_p12 = scmp.ge.s32.totalorder %s447_s11, 2 }
   0xf   : > { %s515_s20 = scalar_select %p34_p7, %s435_s8, %s36_s15  }
  0x10   : > { %p517_p11 = por %p81_p10, %p49_p3  ;;  %p285_p13 = scmp.lt.s32.totalorder %s447_s11, 2 }
  0x11   : > { %s101_s22 = sand.u32 1, %s435_s8   ;;  %s263_s24 = sshll.u32 %s443_s10, 1 }
  0x12   : > { %s262_s23 = sshll.u32 %s101_s22, 1  ;;  %s109_s27 = scalar_lea.hbm %s580_s0, %s263_s24 }
  0x13   : > { %s105_s28 = scalar_lea.vmem [#allocation2], %s262_s23  ;;  %s111_s30 = sshll.u32 %s109_s27, 4  ;;  %s112_s30 = int_to_ptr.hbm [resolvable:$true] %s111_s30 }
  0x14   : > { %s113_s29 = sshll.u32 %s105_s28, 4  ;;  %p278_p0 = pnand %p285_p13, %p500_p4  ;;  %s114_s29 = int_to_ptr.vmem [resolvable:$true] %s113_s29 }
  0x15   : > { %p264_p1 = scmp.ge.s32.totalorder %s447_s11, 1  ;;  %p118_p2 = scmp.lt.s32.totalorder %s447_s11, 3 }
  0x16   : > { %s102_s2 = scalar_lea.sflag [#allocation3], %s101_s22 }
  0x17   : > { %280 = dma.hbm_to_vmem [thread:$0]  (!%p278_p0), %s112_s30, 32, %s114_s29, %s102_s2  }
  0x18   : > { %p119_p3 = pnand %p264_p1, %p118_p2 }
  0x19   : > { %s533_s3 = sand.u32 (!%p119_p3), 1, %s431_s7  }
  0x1a   : > { %122 = sbr.rel (%p119_p3) target bundleno = 47 (0x2f), region = 24  ;;  %s265_s4 = sshll.u32 (!%p119_p3), %s533_s3, 1 }
  0x1b   : > { %s125_s5 = scalar_lea.sflag (!%p119_p3), [#allocation3], %s533_s3  ;;  %s128_s12 = scalar_lea.vmem (!%p119_p3), [#allocation2], %s265_s4 }
  0x1f   : > { %418 = dma.done.wait (%p506_p8), %s125_s5, 32  }
  0x20   : > { %420 = vsyncadd (%p506_p8), %s125_s5, 4294967264  ;;  %s266_s13 = sshll.u32 %s533_s3, 4  ;;  %s272_s15 = sshll.u32 %s439_s9, 4  ;;  %v150_v0 = vld [vmem:[%s128_s12] sm:$0x3] }
  0x21   : > { %s172_s22 = scalar_lea.hbm %s581_s1, %s272_s15  ;;  %s147_s23 = scalar_lea.vmem [#allocation5], %s266_s13  ;;  %v152_v1 = vperm.slane %v150_v0, 0  ;;  %v153_v2 = vperm.slane %v150_v0, 1 }
  0x22   : > { %s174_s24 = sshll.u32 %s147_s23, 4  ;;  %s176_s25 = sshll.u32 %s172_s22, 4  ;;  %s175_s24 = int_to_ptr.vmem [resolvable:$true] %s174_s24  ;;  %s177_s25 = int_to_ptr.hbm [resolvable:$true] %s176_s25 }
  0x23   : > { %156 = vst [vmem:[%s147_s23] sm:$0xff] %v152_v1  ;;  %s159_s18 = scalar_lea.sflag [#allocation4], %s533_s3  ;;  %s379_s26 = sshra.s32 %s177_s25, 4  ;;  %s380_s26 = int_to_ptr.hbm [resolvable:$true] %s379_s26 }
  0x24   : > { %157 = vst [vmem:[%s147_s23 + $0x8] sm:$0xff] %v153_v2  ;;  %s381_s27 = scalar_lea.hbm %s380_s26, 16  ;;  %s385_s29 = scalar_lea.hbm %s581_s1, 32 }
  0x25   : > { %p382_p4 = scmp.ne.s32.totalorder %s380_s26, %s381_s27  ;;  %p386_p7 = scmp.lt.s32.totalorder %s380_s26, %s581_s1 }
  0x26   : > { %p387_p8 = scmp.lt.s32.totalorder %s385_s29, %s381_s27 }
  0x27   : > { %p383_p5 = pnand %p382_p4, %p510_p9 }
  0x28   : > { %p388_p10 = por %p387_p8, %p386_p7 }
  0x29   : > { %p384_p6 = pneg %p383_p5 }
  0x2b   : > { %p389_p13 = pnand %p388_p10, %p384_p6 }
  0x2d   : > { %392 = shalt.err (!%p389_p13)
}
  0x2e   : > { %275 = dma.vmem_to_hbm [thread:$0]  (%p510_p9), %s175_s24, 256, %s177_s25, %s159_s18  }
  0x2f PF: > { %s188_s3 = sand.u32 1, %s427_s6   ;;  %p282_p0 = pnand %p261_p12, %p517_p11 }
  0x30   : > { %s189_s4 = scalar_lea.sflag [#allocation4], %s188_s3 }
  0x31   : > { %p283_p1 = pneg %p282_p0 }
  0x33   : > { %422 = dma.done.wait (%p283_p1), %s189_s4, 256  }
  0x34   : > { %424 = vsyncadd (%p283_p1), %s189_s4, 4294967040  ;;  %s17_s11 = sadd.s32 1, %s447_s11   ;;  %s586_s6 = smov %s431_s7 }
  0x35   : > { %p14_p2 = scmp.ge.s32.totalorder %s17_s11, 4   ;;  %s587_s7 = smov %s435_s8 }
  0x36   : > { %s588_s8 = smov %s515_s20  ;;  %s589_s9 = smov %s443_s10 }
  0x37   : > { %s590_s10 = smov %s592_s14  ;;  %16 = sbr.rel (!%p14_p2) target bundleno = 6 (0x6), region = 69 }
  0x3c   :  { %195 = vsyncpa [#allocation3], 1 }
  0x3d   :  { %197 = vsyncpa [#allocation3 + $0x1], 1 }
  0x3e   :  { %198 = vsyncpa [#allocation4], 1 }
  0x3f   :  { %200 = vsyncpa [#allocation4 + $0x1], 1 }

</bundles_post_ra>
